<compile_context>
chip_gen: v6e
topology: v6e:2x2x1
jax: 0.10.0
libtpu: 0.0.40
codegen_flags: <defaults>
</compile_context>

<pallas_src>
import functools

import jax
import jax.numpy as jnp
import numpy as np
from jax.experimental import pallas as pl
from jax.experimental.pallas import tpu as pltpu


def _tensor_normal_loss_kernel(x_ref, mt_ref, loss_ref, acc_ref, *, inv_denom):
    # x_ref : (26, TILE_N) VMEM slab, rows:
    #           0:5  = outd1.T, 5:10 = outd2.T, 10:15 = outd3.T,
    #           15:20 = d1label.T, 20:23 = d2label[:,0:3].T,
    #           23:26 = d3label[:,0:3].T
    # mt_ref : (1, 1) SMEM scalar (mtloss)
    # loss_ref: (1, 1) SMEM scalar output
    # acc_ref: (1, TILE_N) VMEM f32 vector accumulator across the N-tile grid.
    i = pl.program_id(0)

    @pl.when(i == 0)
    def _init():
        acc_ref[...] = jnp.zeros_like(acc_ref)

    x = x_ref[...].astype(jnp.float32)        # (26, TILE_N), single bulk load
    o1 = x[0:5]
    o2 = x[5:10]
    o3 = x[10:15]
    l1 = x[15:20]
    l2h = x[20:23]
    l3h = x[23:26]

    # head = |d1label - outd1| + |d2label - outd2| + |d3label - outd3|
    # over the first 3 components.
    head = (jnp.abs(l1[0:3] - o1[0:3])
            + jnp.abs(l2h - o2[0:3])
            + jnp.abs(l3h - o3[0:3]))                       # (3, TILE_N)

    # tail = |d1label - (outd1 + outd2 + outd3)/3| over components 3..4.
    area = (o1[3:5] + o2[3:5] + o3[3:5]) * jnp.float32(1.0 / 3.0)
    tail = jnp.abs(l1[3:5] - area)                          # (2, TILE_N)

    # Vector accumulate: only a sublane-axis reduce per tile (XLU has slack).
    acc_ref[...] += (jnp.sum(head, axis=0, keepdims=True)
                     + jnp.sum(tail, axis=0, keepdims=True))

    @pl.when(i == pl.num_programs(0) - 1)
    def _finalize():
        total = jnp.sum(acc_ref[...])          # single full reduce, once
        loss_ref[0, 0] = (total * jnp.float32(inv_denom)
                          + jnp.float32(0.001) * mt_ref[0, 0])


def tensor_normal_loss(outd1, outd2, outd3, label, mtloss,
                       d1annot, d2annot, d3annot, *, tile_n=16384):
    """Pallas port of TensorNormalLoss.forward. Returns (loss, mtloss)."""
    del label  # reshaped but never used by the math in the torch module.

    d1label = jnp.reshape(d1annot, (-1, 5))
    d2label = jnp.reshape(d2annot, (-1, 5))
    d3label = jnp.reshape(d3annot, (-1, 5))

    n = outd1.shape[0]
    if n == 0:
        # torch.mean over an empty concat is NaN; mirror that.
        nan = jnp.float32(float("nan"))
        return nan + jnp.float32(0.001) * jnp.asarray(mtloss, jnp.float32), mtloss

    # Dense lane-dense slab: (26, N).  Only the rows the math reads.
    slab = jnp.concatenate(
        [outd1, outd2, outd3, d1label, d2label[:, 0:3], d3label[:, 0:3]],
        axis=1).T                                            # (26, N)

    # Tile N (lanes) by a multiple of 128; zero-pad N up to whole tiles
    # (zero columns contribute 0 to the sum; denominator uses the real N).
    assert tile_n % 128 == 0
    tile = min(tile_n, pl.cdiv(n, 128) * 128)
    n_pad = pl.cdiv(n, tile) * tile
    if n_pad != n:
        slab = jnp.pad(slab, ((0, 0), (0, n_pad - n)))
    num_tiles = n_pad // tile

    mt = jnp.reshape(jnp.asarray(mtloss, jnp.float32), (1, 1))
    inv_denom = 1.0 / float(n * 11)  # concat has 3+3+3+2 = 11 columns per row.

    kernel = functools.partial(_tensor_normal_loss_kernel, inv_denom=inv_denom)
    smem_spec = pl.BlockSpec(memory_space=pltpu.MemorySpace.SMEM)

    slab_bytes = int(np.prod(slab.shape)) * slab.dtype.itemsize
    cost = pl.CostEstimate(flops=40 * int(n_pad), transcendentals=0,
                           bytes_accessed=slab_bytes + 8)

    loss = pl.pallas_call(
        kernel,
        out_shape=jax.ShapeDtypeStruct((1, 1), jnp.float32),
        grid_spec=pltpu.PrefetchScalarGridSpec(
            num_scalar_prefetch=0,
            grid=(num_tiles,),
            in_specs=[pl.BlockSpec((26, tile), lambda i: (0, i)),
                      smem_spec],
            out_specs=smem_spec,
            scratch_shapes=[pltpu.VMEM((1, tile), jnp.float32)],
        ),
        compiler_params=pltpu.CompilerParams(
            dimension_semantics=("arbitrary",)),
        cost_estimate=cost,
    )(slab, mt)

    return loss[0, 0], mtloss


def _reference(outd1, outd2, outd3, label, mtloss, d1annot, d2annot, d3annot):
    d1label = jnp.reshape(d1annot, (-1, 5))
    d2label = jnp.reshape(d2annot, (-1, 5))
    d3label = jnp.reshape(d3annot, (-1, 5))
    d1err = jnp.abs(d1label[:, 0:3] - outd1[:, 0:3])
    d2err = jnp.abs(d2label[:, 0:3] - outd2[:, 0:3])
    d3err = jnp.abs(d3label[:, 0:3] - outd3[:, 0:3])
    area = (outd1[:, 3:] + outd2[:, 3:] + outd3[:, 3:]) / 3.0
    area_err = jnp.abs(d1label[:, 3:] - area)
    err = jnp.mean(jnp.concatenate((d1err, d2err, d3err, area_err), axis=1))
    return err + 0.001 * mtloss


if __name__ == "__main__":
    key = jax.random.PRNGKey(0)
    ks = jax.random.split(key, 8)

    B, R = 2, 4          # batch=2, 4 rows per batch -> N = 8
    N = B * R

    outd1 = jax.random.normal(ks[0], (N, 5), jnp.float32)
    outd2 = jax.random.normal(ks[1], (N, 5), jnp.float32)
    outd3 = jax.random.normal(ks[2], (N, 5), jnp.float32)
    label = jax.random.normal(ks[3], (B, R, 11), jnp.float32)
    d1annot = jax.random.normal(ks[4], (B, R, 5), jnp.float32)
    d2annot = jax.random.normal(ks[5], (B, R, 5), jnp.float32)
    d3annot = jax.random.normal(ks[6], (B, R, 5), jnp.float32)
    mtloss = jax.random.uniform(ks[7], (), jnp.float32)

    loss, mt_out = tensor_normal_loss(outd1, outd2, outd3, label, mtloss,
                                      d1annot, d2annot, d3annot)
    jax.block_until_ready(loss)
    jax.block_until_ready(mt_out)

    ref = _reference(outd1, outd2, outd3, label, mtloss,
                     d1annot, d2annot, d3annot)
    if not np.allclose(np.asarray(loss), np.asarray(ref), rtol=1e-5, atol=1e-5):
        raise AssertionError(f"mismatch: kernel={loss} ref={ref}")
    if not np.allclose(np.asarray(mt_out), np.asarray(mtloss)):
        raise AssertionError("mtloss passthrough mismatch")

    print("KERNEL_OK")
</pallas_src>

<mosaic_0001>
module attributes {stable_mosaic.version = 11 : i64} {
  func.func @_tensor_normal_loss_kernel(%arg0: i32, %arg1: memref<26x128xf32, #tpu.memory_space<vmem>>, %arg2: memref<1x1xf32, #tpu.memory_space<smem>>, %arg3: memref<1x1xf32, #tpu.memory_space<smem>>, %arg4: memref<1x128xf32, #tpu.memory_space<vmem>>) attributes {dimension_semantics = [#tpu.dimension_semantics<arbitrary>], iteration_bounds = array<i64: 1>, scalar_prefetch = 0 : i64, scratch_operands = 1 : i64, tpu.core_type = #tpu.core_type<tc>, window_params = [{transform_indices = @transform_0, window_bounds = array<i64: 26, 128>}, {transform_indices = @transform_1, window_bounds = array<i64: 1, 1>}, {transform_indices = @transform_2, window_bounds = array<i64: 1, 1>}]} {
    %c0_i32 = arith.constant 0 : i32
    %0 = arith.cmpi eq, %arg0, %c0_i32 : i32
    %1 = arith.extui %0 : i1 to i32
    %c0_i32_0 = arith.constant 0 : i32
    %2 = arith.cmpi ne, %1, %c0_i32_0 : i32
    scf.if %2 {
      %cst_10 = arith.constant 0.000000e+00 : f32
      %43 = vector.broadcast %cst_10 : f32 to vector<1x128xf32>
      %c0_11 = arith.constant 0 : index
      %c0_12 = arith.constant 0 : index
      %44 = vector.load %arg4[%c0_11, %c0_12] : memref<1x128xf32, #tpu.memory_space<vmem>>, vector<1x128xf32>
      tpu.vector_store %arg4[%c0_11, %c0_12], %43 {strides = array<i32>} : memref<1x128xf32, #tpu.memory_space<vmem>>, vector<1x128xf32>,
    } else {
    }
    %c0 = arith.constant 0 : index
    %c0_1 = arith.constant 0 : index
    %3 = vector.load %arg1[%c0, %c0_1] : memref<26x128xf32, #tpu.memory_space<vmem>>, vector<26x128xf32>
    %4 = vector.extract_strided_slice %3 {offsets = [0, 0], sizes = [5, 128], strides = [1, 1]} : vector<26x128xf32> to vector<5x128xf32>
    %5 = vector.extract_strided_slice %3 {offsets = [5, 0], sizes = [5, 128], strides = [1, 1]} : vector<26x128xf32> to vector<5x128xf32>
    %6 = vector.extract_strided_slice %3 {offsets = [10, 0], sizes = [5, 128], strides = [1, 1]} : vector<26x128xf32> to vector<5x128xf32>
    %7 = vector.extract_strided_slice %3 {offsets = [15, 0], sizes = [5, 128], strides = [1, 1]} : vector<26x128xf32> to vector<5x128xf32>
    %8 = vector.extract_strided_slice %3 {offsets = [20, 0], sizes = [3, 128], strides = [1, 1]} : vector<26x128xf32> to vector<3x128xf32>
    %9 = vector.extract_strided_slice %3 {offsets = [23, 0], sizes = [3, 128], strides = [1, 1]} : vector<26x128xf32> to vector<3x128xf32>
    %10 = vector.extract_strided_slice %7 {offsets = [0, 0], sizes = [3, 128], strides = [1, 1]} : vector<5x128xf32> to vector<3x128xf32>
    %11 = vector.extract_strided_slice %4 {offsets = [0, 0], sizes = [3, 128], strides = [1, 1]} : vector<5x128xf32> to vector<3x128xf32>
    %12 = arith.subf %10, %11 : vector<3x128xf32>
    %13 = math.absf %12 : vector<3x128xf32>
    %14 = vector.extract_strided_slice %5 {offsets = [0, 0], sizes = [3, 128], strides = [1, 1]} : vector<5x128xf32> to vector<3x128xf32>
    %15 = arith.subf %8, %14 : vector<3x128xf32>
    %16 = math.absf %15 : vector<3x128xf32>
    %17 = arith.addf %13, %16 : vector<3x128xf32>
    %18 = vector.extract_strided_slice %6 {offsets = [0, 0], sizes = [3, 128], strides = [1, 1]} : vector<5x128xf32> to vector<3x128xf32>
    %19 = arith.subf %9, %18 : vector<3x128xf32>
    %20 = math.absf %19 : vector<3x128xf32>
    %21 = arith.addf %17, %20 : vector<3x128xf32>
    %22 = vector.extract_strided_slice %4 {offsets = [3, 0], sizes = [2, 128], strides = [1, 1]} : vector<5x128xf32> to vector<2x128xf32>
    %23 = vector.extract_strided_slice %5 {offsets = [3, 0], sizes = [2, 128], strides = [1, 1]} : vector<5x128xf32> to vector<2x128xf32>
    %24 = arith.addf %22, %23 : vector<2x128xf32>
    %25 = vector.extract_strided_slice %6 {offsets = [3, 0], sizes = [2, 128], strides = [1, 1]} : vector<5x128xf32> to vector<2x128xf32>
    %26 = arith.addf %24, %25 : vector<2x128xf32>
    %cst = arith.constant 0.333333343 : f32
    %27 = vector.broadcast %cst : f32 to vector<2x128xf32>
    %28 = arith.mulf %26, %27 : vector<2x128xf32>
    %29 = vector.extract_strided_slice %7 {offsets = [3, 0], sizes = [2, 128], strides = [1, 1]} : vector<5x128xf32> to vector<2x128xf32>
    %30 = arith.subf %29, %28 : vector<2x128xf32>
    %31 = math.absf %30 : vector<2x128xf32>
    %c0_2 = arith.constant 0 : index
    %c0_3 = arith.constant 0 : index
    %32 = vector.load %arg4[%c0_2, %c0_3] : memref<1x128xf32, #tpu.memory_space<vmem>>, vector<1x128xf32>
    %cst_4 = arith.constant dense<0.000000e+00> : vector<128xf32>
    %33 = vector.multi_reduction <add>, %21, %cst_4 [0] : vector<3x128xf32> to vector<128xf32>
    %34 = vector.shape_cast %33 : vector<128xf32> to vector<1x128xf32>
    %cst_5 = arith.constant dense<0.000000e+00> : vector<128xf32>
    %35 = vector.multi_reduction <add>, %31, %cst_5 [0] : vector<2x128xf32> to vector<128xf32>
    %36 = vector.shape_cast %35 : vector<128xf32> to vector<1x128xf32>
    %37 = arith.addf %34, %36 : vector<1x128xf32>
    %38 = arith.addf %32, %37 : vector<1x128xf32>
    %c0_6 = arith.constant 0 : index
    %c0_7 = arith.constant 0 : index
    %39 = vector.load %arg4[%c0_6, %c0_7] : memref<1x128xf32, #tpu.memory_space<vmem>>, vector<1x128xf32>
    tpu.vector_store %arg4[%c0_6, %c0_7], %38 {strides = array<i32>} : memref<1x128xf32, #tpu.memory_space<vmem>>, vector<1x128xf32>,
    %c0_i32_8 = arith.constant 0 : i32
    %40 = arith.cmpi eq, %arg0, %c0_i32_8 : i32
    %41 = arith.extui %40 : i1 to i32
    %c0_i32_9 = arith.constant 0 : i32
    %42 = arith.cmpi ne, %41, %c0_i32_9 : i32
    scf.if %42 {
      %c0_10 = arith.constant 0 : index
      %c0_11 = arith.constant 0 : index
      %43 = vector.load %arg4[%c0_10, %c0_11] : memref<1x128xf32, #tpu.memory_space<vmem>>, vector<1x128xf32>
      %44 = vector.shape_cast %43 : vector<1x128xf32> to vector<1x1x128xf32>
      %cst_12 = arith.constant dense<0.000000e+00> : vector<1xf32>
      %45 = vector.multi_reduction <add>, %44, %cst_12 [1, 2] : vector<1x1x128xf32> to vector<1xf32>
      %46 = vector.shape_cast %45 : vector<1xf32> to vector<1x1x1xf32>
      %47 = vector.extract %46[0, 0, 0] : f32 from vector<1x1x1xf32>
      %cst_13 = arith.constant 0.0113636367 : f32
      %48 = arith.mulf %47, %cst_13 : f32
      %c0_14 = arith.constant 0 : index
      %c0_15 = arith.constant 0 : index
      %49 = memref.load %arg2[%c0_14, %c0_15] : memref<1x1xf32, #tpu.memory_space<smem>>
      %cst_16 = arith.constant 1.000000e-03 : f32
      %50 = arith.mulf %cst_16, %49 : f32
      %51 = arith.addf %48, %50 : f32
      %c0_17 = arith.constant 0 : index
      %c0_18 = arith.constant 0 : index
      %52 = memref.load %arg3[%c0_17, %c0_18] : memref<1x1xf32, #tpu.memory_space<smem>>
      memref.store %51, %arg3[%c0_17, %c0_18] : memref<1x1xf32, #tpu.memory_space<smem>>
    } else {
    }
    return
  }
  func.func @transform_0(%arg0: i32) -> (i32, i32) {
    %c0_i32 = arith.constant 0 : i32
    %c0_i32_0 = arith.constant 0 : i32
    return %c0_i32, %arg0 : i32, i32
  }
  func.func @transform_1(%arg0: i32) -> (i32, i32) {
    %c0_i32 = arith.constant 0 : i32
    %c0_i32_0 = arith.constant 0 : i32
    %c0_i32_1 = arith.constant 0 : i32
    return %c0_i32, %c0_i32_0 : i32, i32
  }
  func.func @transform_2(%arg0: i32) -> (i32, i32) {
    %c0_i32 = arith.constant 0 : i32
    %c0_i32_0 = arith.constant 0 : i32
    %c0_i32_1 = arith.constant 0 : i32
    return %c0_i32, %c0_i32_0 : i32, i32
  }
}

</mosaic_0001>

<bundles_post_ra>
// kernel: tpu_custom_call.1
= control target key start
LH: loop header
LB: loop body
LE: loop exit
PB: predicated region body
PF: predicated region fallthrough
CT: control target
= control target key end

     0   :  { %8 = vsyncpa [#allocation5], 0  ;;  %s203_s0 = inlined_call_operand.hbm [shape: f32[26,128], index: 0, kind: input, shape index: {}]   ;;  %s204_s1 = inlined_call_operand.<no memory space> [shape: f32[1,1], index: 1, kind: input, shape index: {}]   ;;  %s205_s2 = inlined_call_operand.hbm [shape: f32[1,1], index: 2, kind: output, shape index: {}]  }
   0x1   :  { %9 = vsyncpa [#allocation6], 0  ;;  %s172_s9 = smov [#allocation4]  }
   0x2   :  { %s15_s10 = sshll.u32 %s172_s9, 4  ;;  %s16_s10 = int_to_ptr.vmem [resolvable:$true] %s15_s10 }
   0x3   :  { %s148_s11 = scalar_lea.vmem %s16_s10, 512  ;;  %p153_p1 = scmp.lt.s32.totalorder %s16_s10, %s16_s10 }
   0x4   :  { %p149_p0 = scmp.ne.s32.totalorder %s16_s10, %s148_s11  ;;  %p154_p2 = scmp.lt.s32.totalorder %s148_s11, %s148_s11 }
   0x6   :  { %p155_p3 = por %p154_p2, %p153_p1 }
   0x8   :  { %p156_p4 = pnand %p155_p3, %p149_p0 }
   0xa   :  { %159 = shalt.err (!%p156_p4)
}
   0xb   :  { %s173_s12 = smov 128   ;;  %s174_s13 = smov 8  }
   0xc   :  { %21 = dma.hbm_to_vmem [thread:$0]  %s203_s0, 512, %s16_s10, [#allocation5], %s173_s12, %s173_s12, %s174_s13  }
   0xd   :  { %168 = dma.done.wait [#allocation5], 512  }
   0xe   :  { %169 = vsyncadd [#allocation5], 4294966784  ;;  %v175_v0 = vmov 0.0   ;;  %v32_v1 = vld [vmem:[#allocation4] sm:$0xff]  ;;  %v33_v2 = vld [vmem:[#allocation4 + $0x8] sm:$0xff]  ;;  %vm72_vm0 = vcmask 1040384  }
   0xf   :  { %31 = vst [vmem:[#allocation2] sm:$0x1] %v175_v0  ;;  %v34_v3 = vld [vmem:[#allocation4 + $0x10] sm:$0xff]  ;;  %v35_v4 = vld [vmem:[#allocation4 + $0x18] sm:$0x3]  ;;  %v37_v5 = vrot.slane %v32_v1, 1 }
  0x10   :  { %v49_v6 = vrot.slane %v33_v2, 3  ;;  %v57_v7 = vrot.slane %v33_v2, 5  ;;  %v60_v8 = vrot.slane %v33_v2, 2  ;;  %vm77_vm1 = vcmask 1042432   ;;  %s115_s17 = smul.f32 0.001, %s204_s1 }
  0x11   :  { %v39_v9 = vsub.f32 %v33_v2, %v37_v5  ;;  %v40_v10 = vsub.f32 %v34_v3, %v37_v5  ;;  %vm88_vm2 = vcmask 1041408   ;;  %s176_s21 = smov [#allocation7]  }
  0x12   :  { %v51_v11 = vsub.f32 %v34_v3, %v49_v6  ;;  %v52_v12 = vsub.f32 %v35_v4, %v49_v6  ;;  %v59_v13 = vadd.f32 %v57_v7, %v32_v1 }
  0x13   :  { %v41_v14 = vand.u32 2147483647, %v39_v9  ;;  %v42_v15 = vand.u32 2147483647, %v40_v10 }
  0x14   :  { %v62_v16 = vadd.f32 %v60_v8, %v59_v13  ;;  %v53_v18 = vand.u32 2147483647, %v51_v11  ;;  %v54_v19 = vand.u32 2147483647, %v52_v12 }
  0x15   :  { %v44_v17 = vrot.slane %v42_v15, 5 }
  0x16   :  { %v63_v20 = vmul.f32 0.33333334, %v62_v16  ;;  %v69_v46 = vld [vmem:[#allocation2] sm:$0x1] }
  0x17   :  { %v46_v21 = vadd.f32 %v44_v17, %v41_v14  ;;  %v47_v22 = vadd.f32 %v44_v17, %v42_v15 }
  0x18   :  { %v65_v23 = vrot.slane %v63_v20, 1 }
  0x19   :  { %v55_v24 = vadd.f32 %v53_v18, %v46_v21  ;;  %v56_v25 = vadd.f32 %v54_v19, %v47_v22 }
  0x1a   :  { %v67_v26 = vsub.f32 %v34_v3, %v65_v23 }
  0x1b   :  { %v73_v27 = vrot.slane %v55_v24, 7  ;;  %v74_v28 = vrot.slane %v56_v25, 7 }
  0x1c   :  { %v68_v29 = vand.u32 2147483647, %v67_v26 }
  0x1d   :  { %v75_v30 = vsel %vm72_vm0, %v73_v27, %v74_v28 }
  0x1e   :  { %v78_v31 = vsel %vm77_vm1, %v75_v30, 0.0  ;;  %v86_v32 = vrot.slane %v68_v29, 2 }
  0x1f   :  { %v79_v33 = vrot.slane %v78_v31, 4 }
  0x20   :  { %v89_v34 = vsel %vm88_vm2, %v86_v32, 0.0 }
  0x21   :  { %v80_v35 = vadd.f32 %v79_v33, %v78_v31  ;;  %v90_v36 = vrot.slane %v89_v34, 4 }
  0x23   :  { %v81_v37 = vrot.slane %v80_v35, 2  ;;  %v91_v38 = vadd.f32 %v90_v36, %v89_v34 }
  0x25   :  { %v82_v39 = vadd.f32 %v81_v37, %v80_v35  ;;  %v92_v40 = vrot.slane %v91_v38, 2 }
  0x27   :  { %v83_v41 = vrot.slane %v82_v39, 1  ;;  %v93_v42 = vadd.f32 %v92_v40, %v91_v38 }
  0x29   :  { %v84_v43 = vadd.f32 %v83_v41, %v82_v39  ;;  %v94_v44 = vrot.slane %v93_v42, 1 }
  0x2b   :  { %v95_v45 = vadd.f32 %v94_v44, %v93_v42 }
  0x2d   :  { %v96_v47 = vadd.f32 %v95_v45, %v84_v43 }
  0x2f   :  { %v97_v48 = vadd.f32 %v96_v47, %v69_v46 }
  0x31   :  { %98 = vst [vmem:[#allocation2] sm:$0x1] %v97_v48 }
  0x38   :  { %v102_v49 = vld [vmem:[#allocation2] sm:$0x1] }
  0x39   :  { %v103_v50 = vsel %vm72_vm0, %v102_v49, 0.0 }
  0x3a   :  { %104 = vadd.xlane.f32.xlu0 %v103_v50 }
  0xc3   :  { %v105_v51 = vpop.xlane.xlu0 %104 }
  0xc4   :  { %v106_v52 = vrot.slane %v105_v51, 4 }
  0xc6   :  { %v107_v53 = vadd.f32 %v106_v52, %v105_v51 }
  0xc8   :  { %v108_v54 = vrot.slane %v107_v53, 2 }
  0xca   :  { %v109_v55 = vadd.f32 %v108_v54, %v107_v53 }
  0xcc   :  { %v110_v56 = vrot.slane %v109_v55, 1 }
  0xce   :  { %v111_v57 = vadd.f32 %v110_v56, %v109_v55 }
  0xd0   :  { %133 = vpush %v111_v57 }
 0x101   :  { %s134_s18 = spop %133 }
 0x102   :  { %s113_s19 = smul.f32 0.011363637, %s134_s18 }
 0x104   :  { %s116_s20 = sadd.f32 %s115_s17, %s113_s19 }
 0x106   :  { %118 = sst [smem:[#allocation7]] %s116_s20 }
 0x107   :  { %126 = dma.smem_to_hbm %s176_s21, 16, %s205_s2, [#allocation6]  }
 0x108   :  { %170 = dma.done.wait [#allocation6], 16  }
 0x109   :  { %171 = vsyncadd [#allocation6], 4294967280 }
 0x10a   :  { %130 = sfence }
 0x10b   :  { %131 = vsyncpa [#allocation5], 1 }
 0x10c   :  { %132 = vsyncpa [#allocation6], 1 }

</bundles_post_ra>
